<compile_context>
chip_gen: v5e
topology: v5e:2x2
jax: 0.10.0
libtpu: 0.0.40
codegen_flags: <defaults>
</compile_context>

<pallas_src>
import functools

import jax
import jax.numpy as jnp
from jax.experimental import pallas as pl
from jax.experimental.pallas import tpu as pltpu


def _round_up(x, m):
    return ((x + m - 1) // m) * m


def _softmax_head_kernel(x_ref, w_ref, b_ref, logits_ref, action_ref, *,
                         first_act, out_dim):
    # x_ref: (block_b, F) ; w_ref: (F, O_pad) resident ; b_ref: (1, O_pad) resident
    x = x_ref[...]
    if not first_act:
        x = jnp.maximum(x, 0.0)  # nn.ReLU() pre-activation when first_act=False

    # Linear: MXU matmul, f32 accumulation; operands stay in their native dtype.
    logits = jnp.dot(x, w_ref[...], preferred_element_type=jnp.float32)
    logits = logits + b_ref[...].astype(jnp.float32)
    logits_ref[...] = logits.astype(logits_ref.dtype)

    # Deterministic action = argmax over the *real* (unpadded) output columns,
    # first occurrence on ties (matches torch.argmax / jnp.argmax).
    o_pad = logits.shape[-1]
    col = jax.lax.broadcasted_iota(jnp.int32, logits.shape, 1)
    valid = col < out_dim
    masked = jnp.where(valid, logits, jnp.finfo(jnp.float32).min)
    row_max = jnp.max(masked, axis=-1, keepdims=True)
    is_max = (masked == row_max) & valid
    action = jnp.min(jnp.where(is_max, col, jnp.int32(o_pad)), axis=-1)  # (block_b,)
    # Lane-dense store: whole block's actions leave as one 128-lane-aligned row.
    action_ref[...] = action.astype(jnp.int32).reshape(action_ref.shape)


def _pick_block_b(F, O_pad, x_bytes, w_bytes, l_bytes, budget_bytes=24 << 20):
    """Pick a batch tile that fits comfortably in VMEM on all generations (v7x=64MiB)."""
    resident = 2 * (F * O_pad * w_bytes + O_pad * 4)          # weight + bias (2 bufs)
    per_row = 2 * (F * x_bytes + O_pad * l_bytes + 4)         # in + logits + action, 2 bufs
    avail = max(budget_bytes - resident, 128 * per_row)
    bb = (avail // per_row) // 128 * 128
    return int(max(128, min(2048, bb)))


def softmax_head_forward(feature, weight, bias, *, first_act=True,
                         logits_dtype=jnp.float32, block_b=None):
    """feature: [B, F], weight: [F, O] (transpose of nn.Linear's [O, F]), bias: [O].

    Returns (logits [B, O] in `logits_dtype`, best_action [B] int32).
    """
    B, F = feature.shape
    F_w, O = weight.shape
    assert F_w == F, "weight must be [feature_dim, output_dim]"

    O_pad = _round_up(max(O, 1), 128)             # lane-dense logits / MXU N dim
    x_bytes = jnp.dtype(feature.dtype).itemsize
    w_bytes = jnp.dtype(weight.dtype).itemsize
    l_bytes = jnp.dtype(logits_dtype).itemsize

    if block_b is None:
        block_b = _pick_block_b(F, O_pad, x_bytes, w_bytes, l_bytes)
    block_b = max(128, _round_up(block_b, 128))
    block_b = min(block_b, _round_up(B, 128))     # don't over-tile tiny batches

    num_blocks = pl.cdiv(B, block_b)
    B_pad = num_blocks * block_b

    # Wrapper-side padding (zero rows / zero output columns; masked in-kernel).
    feature_p = feature if B_pad == B else jnp.pad(feature, ((0, B_pad - B), (0, 0)))
    weight_p = weight if O_pad == O else jnp.pad(weight, ((0, 0), (0, O_pad - O)))
    bias_p = bias.reshape(1, O)
    if O_pad != O:
        bias_p = jnp.pad(bias_p, ((0, 0), (0, O_pad - O)))

    kernel = functools.partial(_softmax_head_kernel, first_act=first_act, out_dim=O)

    # VMEM budget: resident weight/bias + double-buffered feature/logits/action tiles.
    resident = 2 * (F * O_pad * w_bytes + O_pad * 4)
    per_step = 2 * block_b * (F * x_bytes + O_pad * l_bytes + 4)
    vmem_limit = int(min(60 << 20, max(resident + per_step + (8 << 20), 32 << 20)))

    logits_p, action_p = pl.pallas_call(
        kernel,
        out_shape=(
            jax.ShapeDtypeStruct((B_pad, O_pad), logits_dtype),
            jax.ShapeDtypeStruct((num_blocks, 1, block_b), jnp.int32),
        ),
        grid=(num_blocks,),
        in_specs=[
            pl.BlockSpec((block_b, F), lambda i: (i, 0)),   # batch-tiled feature
            pl.BlockSpec((F, O_pad), lambda i: (0, 0)),     # weight stays VMEM-resident
            pl.BlockSpec((1, O_pad), lambda i: (0, 0)),     # bias stays VMEM-resident
        ],
        out_specs=(
            pl.BlockSpec((block_b, O_pad), lambda i: (i, 0)),
            pl.BlockSpec((1, 1, block_b), lambda i: (i, 0, 0)),  # lane-dense action slab
        ),
        compiler_params=pltpu.CompilerParams(
            dimension_semantics=("parallel",),   # v7x: shard batch axis across 2 TCs
            vmem_limit_bytes=vmem_limit,
        ),
    )(feature_p, weight_p, bias_p)

    logits = logits_p[:B, :O]
    action = action_p.reshape(B_pad)[:B]
    return logits, action


if __name__ == "__main__":
    # Small shapes consistent with the module: batch=4, feature_dim=32, output_dim=8
    B, FEAT, OUT = 4, 32, 8
    key = jax.random.PRNGKey(0)
    k_x, k_w, k_b = jax.random.split(key, 3)

    feature = jax.random.normal(k_x, (B, FEAT), dtype=jnp.float32)
    # Mimic nn.Linear's U(-1/sqrt(fan_in), 1/sqrt(fan_in)) init
    bound = 1.0 / jnp.sqrt(jnp.float32(FEAT))
    weight = jax.random.uniform(k_w, (FEAT, OUT), jnp.float32, -bound, bound)
    bias = jax.random.uniform(k_b, (OUT,), jnp.float32, -bound, bound)

    # first_act=True -> Identity pre-activation
    logits, action = softmax_head_forward(feature, weight, bias, first_act=True)
    jax.block_until_ready((logits, action))
    ref_logits = feature @ weight + bias
    ref_action = jnp.argmax(ref_logits, axis=1)
    assert logits.shape == (B, OUT) and action.shape == (B,)
    assert jnp.allclose(logits, ref_logits, atol=1e-5, rtol=1e-5)
    assert jnp.array_equal(action, ref_action)

    # first_act=False -> ReLU pre-activation; also exercise a multi-block grid (B > block_b)
    B2 = 260
    feature2 = jax.random.normal(jax.random.PRNGKey(1), (B2, FEAT), dtype=jnp.float32)
    logits2, action2 = softmax_head_forward(feature2, weight, bias,
                                            first_act=False, block_b=128)
    jax.block_until_ready((logits2, action2))
    ref_logits2 = jnp.maximum(feature2, 0.0) @ weight + bias
    ref_action2 = jnp.argmax(ref_logits2, axis=1)
    assert logits2.shape == (B2, OUT) and action2.shape == (B2,)
    assert jnp.allclose(logits2, ref_logits2, atol=1e-5, rtol=1e-5)
    assert jnp.array_equal(action2, ref_action2)

    print("KERNEL_OK")
</pallas_src>

<mosaic_0001>
module attributes {stable_mosaic.version = 11 : i64} {
  func.func @_softmax_head_kernel(%arg0: i32, %arg1: memref<128x32xf32, #tpu.memory_space<vmem>>, %arg2: memref<32x128xf32, #tpu.memory_space<vmem>>, %arg3: memref<1x128xf32, #tpu.memory_space<vmem>>, %arg4: memref<128x128xf32, #tpu.memory_space<vmem>>, %arg5: memref<1x1x128xi32, #tpu.memory_space<vmem>>) attributes {dimension_semantics = [#tpu.dimension_semantics<parallel>], iteration_bounds = array<i64: 1>, scalar_prefetch = 0 : i64, scratch_operands = 0 : i64, tpu.core_type = #tpu.core_type<tc>, window_params = [{transform_indices = @transform_0, window_bounds = array<i64: 128, 32>}, {pipeline_mode = #tpu.pipeline_mode<synchronous>, transform_indices = @transform_1, window_bounds = array<i64: 32, 128>}, {pipeline_mode = #tpu.pipeline_mode<synchronous>, transform_indices = @transform_2, window_bounds = array<i64: 1, 128>}, {transform_indices = @transform_3, window_bounds = array<i64: 128, 128>}, {transform_indices = @transform_4, window_bounds = array<i64: 1, 1, 128>}]} {
    %c0 = arith.constant 0 : index
    %c0_0 = arith.constant 0 : index
    %0 = vector.load %arg1[%c0, %c0_0] : memref<128x32xf32, #tpu.memory_space<vmem>>, vector<128x32xf32>
    %c0_1 = arith.constant 0 : index
    %c0_2 = arith.constant 0 : index
    %1 = vector.load %arg2[%c0_1, %c0_2] : memref<32x128xf32, #tpu.memory_space<vmem>>, vector<32x128xf32>
    %cst = arith.constant dense<0.000000e+00> : vector<128x128xf32>
    %2 = tpu.matmul %0, %1, %cst {dimension_numbers = #tpu.dot_dimension_numbers<[1], [0], [0], [1], [0, 0, 1, 1], [], []>} : vector<128x32xf32>, vector<32x128xf32>, vector<128x128xf32> -> vector<128x128xf32>
    %c0_3 = arith.constant 0 : index
    %c0_4 = arith.constant 0 : index
    %3 = vector.load %arg3[%c0_3, %c0_4] : memref<1x128xf32, #tpu.memory_space<vmem>>, vector<1x128xf32>
    %4 = vector.broadcast %3 : vector<1x128xf32> to vector<128x128xf32>
    %5 = arith.addf %2, %4 : vector<128x128xf32>
    %c0_5 = arith.constant 0 : index
    %c0_6 = arith.constant 0 : index
    %6 = vector.load %arg4[%c0_5, %c0_6] : memref<128x128xf32, #tpu.memory_space<vmem>>, vector<128x128xf32>
    tpu.vector_store %arg4[%c0_5, %c0_6], %5 {strides = array<i32>} : memref<128x128xf32, #tpu.memory_space<vmem>>, vector<128x128xf32>,
    %7 = tpu.iota {dimensions = array<i32: 1>} : vector<128x128xi32>
    %c8_i32 = arith.constant 8 : i32
    %8 = vector.broadcast %c8_i32 : i32 to vector<128x128xi32>
    %9 = arith.cmpi slt, %7, %8 : vector<128x128xi32>
    %cst_7 = arith.constant -3.40282347E+38 : f32
    %10 = vector.broadcast %cst_7 : f32 to vector<128x128xf32>
    %11 = arith.select %9, %5, %10 : vector<128x128xi1>, vector<128x128xf32>
    %cst_8 = arith.constant dense<0xFF800000> : vector<128xf32>
    %12 = vector.multi_reduction <maximumf>, %11, %cst_8 [1] : vector<128x128xf32> to vector<128xf32>
    %13 = vector.shape_cast %12 : vector<128xf32> to vector<128x1xf32>
    %14 = vector.broadcast %13 : vector<128x1xf32> to vector<128x128xf32>
    %15 = arith.cmpf oeq, %11, %14 : vector<128x128xf32>
    %16 = arith.andi %15, %9 : vector<128x128xi1>
    %c128_i32 = arith.constant 128 : i32
    %17 = vector.broadcast %c128_i32 : i32 to vector<128x128xi32>
    %18 = arith.select %16, %7, %17 : vector<128x128xi1>, vector<128x128xi32>
    %cst_9 = arith.constant dense<2147483647> : vector<128xi32>
    %19 = vector.multi_reduction <minsi>, %18, %cst_9 [1] : vector<128x128xi32> to vector<128xi32>
    %20 = vector.shape_cast %19 : vector<128xi32> to vector<1x1x128xi32>
    %c0_10 = arith.constant 0 : index
    %c0_11 = arith.constant 0 : index
    %c0_12 = arith.constant 0 : index
    %21 = vector.load %arg5[%c0_10, %c0_11, %c0_12] : memref<1x1x128xi32, #tpu.memory_space<vmem>>, vector<1x1x128xi32>
    tpu.vector_store %arg5[%c0_10, %c0_11, %c0_12], %20 {strides = array<i32>} : memref<1x1x128xi32, #tpu.memory_space<vmem>>, vector<1x1x128xi32>,
    return
  }
  func.func @transform_0(%arg0: i32) -> (i32, i32) {
    %c0_i32 = arith.constant 0 : i32
    %c0_i32_0 = arith.constant 0 : i32
    return %arg0, %c0_i32 : i32, i32
  }
  func.func @transform_1(%arg0: i32) -> (i32, i32) {
    %c0_i32 = arith.constant 0 : i32
    %c0_i32_0 = arith.constant 0 : i32
    %c0_i32_1 = arith.constant 0 : i32
    return %c0_i32, %c0_i32_0 : i32, i32
  }
  func.func @transform_2(%arg0: i32) -> (i32, i32) {
    %c0_i32 = arith.constant 0 : i32
    %c0_i32_0 = arith.constant 0 : i32
    %c0_i32_1 = arith.constant 0 : i32
    return %c0_i32, %c0_i32_0 : i32, i32
  }
  func.func @transform_3(%arg0: i32) -> (i32, i32) {
    %c0_i32 = arith.constant 0 : i32
    %c0_i32_0 = arith.constant 0 : i32
    return %arg0, %c0_i32 : i32, i32
  }
  func.func @transform_4(%arg0: i32) -> (i32, i32, i32) {
    %c0_i32 = arith.constant 0 : i32
    %c0_i32_0 = arith.constant 0 : i32
    %c0_i32_1 = arith.constant 0 : i32
    return %arg0, %c0_i32, %c0_i32_0 : i32, i32, i32
  }
}

</mosaic_0001>

<bundles_post_ra>
// kernel: tpu_custom_call.1
= control target key start
LH: loop header
LB: loop body
LE: loop exit
PB: predicated region body
PF: predicated region fallthrough
CT: control target
= control target key end

     0   :  { %10 = vsyncpa [#allocation3], 0  ;;  %vm42_vm0 = vcmask 261120   ;;  %s1177_s0 = inlined_call_operand.vmem [shape: f32[128,32], index: 0, kind: input, shape index: {}]   ;;  %s1178_s1 = inlined_call_operand.vmem [shape: f32[32,128], index: 1, kind: input, shape index: {}]   ;;  %s1179_s2 = inlined_call_operand.vmem [shape: f32[1,128], index: 2, kind: input, shape index: {}]   ;;  %s1180_s3 = inlined_call_operand.hbm [shape: f32[128,128], index: 3, kind: output, shape index: {0}]   ;;  %s1181_s4 = inlined_call_operand.hbm [shape: s32[1,1,128], index: 4, kind: output, shape index: {1}]  }
   0x1   :  { %v37_v0 = vld [vmem:[%s1178_s1 + $0x18] sm:$0xff]  ;;  %v36_v1 = vld [vmem:[%s1178_s1 + $0x10] sm:$0xff]  ;;  %v35_v2 = vld [vmem:[%s1178_s1 + $0x8] sm:$0xff] }
   0x2   :  { %103 = vmatpush.msra.mxu0 %v37_v0  ;;  %607 = vmatpush.msra.mxu1 %v37_v0  ;;  %v34_v3 = vld [vmem:[%s1178_s1] sm:$0xff] }
   0x3   :  { %608 = vmatpush.msra.mxu2 %v37_v0  ;;  %609 = vmatpush.msra.mxu3 %v37_v0  ;;  %v18_v4 = vld [vmem:[%s1177_s0] sm:$0xff] }
   0x4   :  { %104 = vmatpush.msra.mxu0 %v36_v1  ;;  %610 = vmatpush.msra.mxu1 %v36_v1  ;;  %v22_v5 = vld [vmem:[%s1177_s0 + $0x20] sm:$0xff] }
   0x5   :  { %611 = vmatpush.msra.mxu2 %v36_v1  ;;  %612 = vmatpush.msra.mxu3 %v36_v1  ;;  %v26_v6 = vld [vmem:[%s1177_s0 + $0x40] sm:$0xff] }
   0x6   :  { %105 = vmatpush.msra.mxu0 %v35_v2  ;;  %613 = vmatpush.msra.mxu1 %v35_v2 }
   0x7   :  { %614 = vmatpush.msra.mxu2 %v35_v2  ;;  %615 = vmatpush.msra.mxu3 %v35_v2 }
   0x8   :  { %106 = vmatpush.msra.mxu0 %v34_v3  ;;  %616 = vmatpush.msra.mxu1 %v34_v3 }
   0x9   :  { %11 = vsyncpa [#allocation5], 0  ;;  %617 = vmatpush.msra.mxu2 %v34_v3  ;;  %591 = vmatmul.msk.f32.vlgmr.msra.gmra.mxu0 %vm42_vm0, %v18_v4  ;;  %v30_v7 = vld [vmem:[%s1177_s0 + $0x60] sm:$0xff]  ;;  %v19_v8 = vld [vmem:[%s1177_s0 + $0x8] sm:$0xff]  ;;  %v172_v20 = vlaneseq  ;;  %s563_s29 = sshll.u32 %s1180_s3, 4  ;;  %s676_s30 = smov [#allocation2]   ;;  %s564_s29 = int_to_ptr.hbm [resolvable:$true] %s563_s29 }
   0xa   :  { %595 = vmatmul.msk.f32.vlgmr.msra.gmra.mxu1 %vm42_vm0, %v22_v5  ;;  %599 = vmatmul.msk.f32.vlgmr.msra.gmra.mxu2 %vm42_vm0, %v26_v6  ;;  %v27_v9 = vld [vmem:[%s1177_s0 + $0x48] sm:$0xff]  ;;  %v20_v12 = vld [vmem:[%s1177_s0 + $0x10] sm:$0xff]  ;;  %v21_v16 = vld [vmem:[%s1177_s0 + $0x18] sm:$0xff]  ;;  %s561_s5 = sshll.u32 %s676_s30, 4  ;;  %s677_s6 = smov 128   ;;  %s562_s5 = int_to_ptr.vmem [resolvable:$true] %s561_s5 }
   0xb   :  { %618 = vmatpush.msra.mxu3 %v34_v3  ;;  %v23_v10 = vld [vmem:[%s1177_s0 + $0x28] sm:$0xff]  ;;  %v28_v13 = vld [vmem:[%s1177_s0 + $0x50] sm:$0xff]  ;;  %v29_v17 = vld [vmem:[%s1177_s0 + $0x58] sm:$0xff]  ;;  %v781_v21 = vand.u32 127, %v172_v20  ;;  %s678_s7 = smov 8   ;;  %s679_s3 = smov [#allocation4]  }
   0xc   :  { %603 = vmatmul.msk.f32.vlgmr.msra.gmra.mxu3 %vm42_vm0, %v30_v7  ;;  %v31_v11 = vld [vmem:[%s1177_s0 + $0x68] sm:$0xff]  ;;  %v24_v14 = vld [vmem:[%s1177_s0 + $0x30] sm:$0xff]  ;;  %v25_v18 = vld [vmem:[%s1177_s0 + $0x38] sm:$0xff]  ;;  %s575_s8 = sshll.u32 %s679_s3, 4  ;;  %s577_s11 = sshll.u32 %s1181_s4, 4  ;;  %s576_s8 = int_to_ptr.vmem [resolvable:$true] %s575_s8  ;;  %s578_s11 = int_to_ptr.hbm [resolvable:$true] %s577_s11 }
   0xd   :  { %v32_v15 = vld [vmem:[%s1177_s0 + $0x70] sm:$0xff]  ;;  %v33_v19 = vld [vmem:[%s1177_s0 + $0x78] sm:$0xff]  ;;  %v786_v22 = vld [vmem:[%s1179_s2] ss:$0 sm:$0xff]  ;;  %vm174_vm1 = vcmp.lt.s32.totalorder %v781_v21, 8 }
  0x11   :  { %592 = vmatmul.msk.f32.gmra.mxu0 %vm42_vm0, %v19_v8 }
  0x12   :  { %600 = vmatmul.msk.f32.gmra.mxu2 %vm42_vm0, %v27_v9  ;;  %596 = vmatmul.msk.f32.gmra.mxu1 %vm42_vm0, %v23_v10 }
  0x14   :  { %604 = vmatmul.msk.f32.gmra.mxu3 %vm42_vm0, %v31_v11 }
  0x19   :  { %593 = vmatmul.msk.f32.gmra.mxu0 %vm42_vm0, %v20_v12 }
  0x1a   :  { %601 = vmatmul.msk.f32.gmra.mxu2 %vm42_vm0, %v28_v13  ;;  %597 = vmatmul.msk.f32.gmra.mxu1 %vm42_vm0, %v24_v14 }
  0x1c   :  { %605 = vmatmul.msk.f32.gmra.mxu3 %vm42_vm0, %v32_v15 }
  0x21   :  { %594 = vmatmul.msk.f32.gmra.mxu0 %vm42_vm0, %v21_v16 }
  0x22   :  { %602 = vmatmul.msk.f32.gmra.mxu2 %vm42_vm0, %v29_v17  ;;  %598 = vmatmul.msk.f32.gmra.mxu1 %vm42_vm0, %v25_v18 }
  0x24   :  { %606 = vmatmul.msk.f32.gmra.mxu3 %vm42_vm0, %v33_v19 }
  0x86   :  { %v108_v23 = vpop.f32.mrf.mxu0 }
  0x87   :  { %v109_v24 = vadd.f32 %v786_v22, %v108_v23  ;;  %v120_v25 = vpop.f32.mrf.mxu1 }
  0x88   :  { %v121_v26 = vadd.f32 %v786_v22, %v120_v25 }
  0x89   :  { %156 = vst [vmem:[#allocation2] sm:$0xff] %v109_v24  ;;  %v793_v27 = vsel %vm174_vm1, %v109_v24, -3.4028235e+38 }
  0x8a   :  { %160 = vst [vmem:[#allocation2 + $0x20] sm:$0xff] %v121_v26  ;;  %v797_v28 = vsel %vm174_vm1, %v121_v26, -3.4028235e+38  ;;  %191 = vmax.xlane.f32.xlu0 %v793_v27 }
  0x8b   :  { %199 = vmax.xlane.f32.xlu2 %v797_v28 }
  0x8d   :  { %v132_v29 = vpop.f32.mrf.mxu2 }
  0x8e   :  { %v133_v30 = vadd.f32 %v786_v22, %v132_v29  ;;  %v111_v31 = vpop.f32.mrf.mxu0 }
  0x8f   :  { %v112_v32 = vadd.f32 %v786_v22, %v111_v31  ;;  %v123_v33 = vpop.f32.mrf.mxu1  ;;  %v144_v34 = vpop.f32.mrf.mxu3 }
  0x90   :  { %164 = vst [vmem:[#allocation2 + $0x40] sm:$0xff] %v133_v30  ;;  %v805_v35 = vsel %vm174_vm1, %v133_v30, -3.4028235e+38  ;;  %v124_v36 = vadd.f32 %v786_v22, %v123_v33  ;;  %v145_v37 = vadd.f32 %v786_v22, %v144_v34 }
  0x91   :  { %157 = vst [vmem:[#allocation2 + $0x8] sm:$0xff] %v112_v32  ;;  %v811_v38 = vsel %vm174_vm1, %v112_v32, -3.4028235e+38 }
  0x92   :  { %193 = vmax.xlane.f32.xlu0 %v811_v38  ;;  %161 = vst [vmem:[#allocation2 + $0x28] sm:$0xff] %v124_v36  ;;  %v819_v45 = vsel %vm174_vm1, %v124_v36, -3.4028235e+38  ;;  %v861_v2 = vsel %vm174_vm1, %v145_v37, -3.4028235e+38 }
  0x93   :  { %207 = vmax.xlane.f32.xlu2 %v805_v35  ;;  %168 = vst [vmem:[#allocation2 + $0x60] sm:$0xff] %v145_v37 }
  0x95   :  { %v135_v39 = vpop.f32.mrf.mxu2 }
  0x96   :  { %v136_v40 = vadd.f32 %v786_v22, %v135_v39  ;;  %v114_v41 = vpop.f32.mrf.mxu0 }
  0x97   :  { %v115_v42 = vadd.f32 %v786_v22, %v114_v41  ;;  %v126_v43 = vpop.f32.mrf.mxu1  ;;  %v147_v44 = vpop.f32.mrf.mxu3 }
  0x98   :  { %165 = vst [vmem:[#allocation2 + $0x48] sm:$0xff] %v136_v40  ;;  %v823_v46 = vsel %vm174_vm1, %v136_v40, -3.4028235e+38  ;;  %v127_v47 = vadd.f32 %v786_v22, %v126_v43  ;;  %v148_v48 = vadd.f32 %v786_v22, %v147_v44 }
  0x99   :  { %158 = vst [vmem:[#allocation2 + $0x10] sm:$0xff] %v115_v42  ;;  %v829_v49 = vsel %vm174_vm1, %v115_v42, -3.4028235e+38 }
  0x9a   :  { %195 = vmax.xlane.f32.xlu1 %v829_v49  ;;  %209 = vmax.xlane.f32.xlu0 %v823_v46  ;;  %162 = vst [vmem:[#allocation2 + $0x30] sm:$0xff] %v127_v47  ;;  %v837_v53 = vsel %vm174_vm1, %v127_v47, -3.4028235e+38  ;;  %v882_v6 = vsel %vm174_vm1, %v148_v48, -3.4028235e+38 }
  0x9b   :  { %201 = vmax.xlane.f32.xlu2 %v819_v45  ;;  %169 = vst [vmem:[#allocation2 + $0x68] sm:$0xff] %v148_v48 }
  0x9d   :  { %v138_v50 = vpop.f32.mrf.mxu2 }
  0x9e   :  { %v139_v51 = vadd.f32 %v786_v22, %v138_v50  ;;  %v117_v52 = vpop.f32.mrf.mxu0 }
  0x9f   :  { %v118_v54 = vadd.f32 %v786_v22, %v117_v52  ;;  %v150_v55 = vpop.f32.mrf.mxu3  ;;  %v129_v56 = vpop.f32.mrf.mxu1 }
  0xa0   :  { %166 = vst [vmem:[#allocation2 + $0x50] sm:$0xff] %v139_v51  ;;  %v842_v57 = vsel %vm174_vm1, %v139_v51, -3.4028235e+38  ;;  %v151_v58 = vadd.f32 %v786_v22, %v150_v55  ;;  %v130_v59 = vadd.f32 %v786_v22, %v129_v56 }
  0xa1   :  { %159 = vst [vmem:[#allocation2 + $0x18] sm:$0xff] %v118_v54  ;;  %v851_v62 = vsel %vm174_vm1, %v118_v54, -3.4028235e+38 }
  0xa2   :  { %211 = vmax.xlane.f32.xlu1 %v842_v57  ;;  %203 = vmax.xlane.f32.xlu0 %v837_v53  ;;  %170 = vst [vmem:[#allocation2 + $0x70] sm:$0xff] %v151_v58  ;;  %v867_v3 = vsel %vm174_vm1, %v151_v58, -3.4028235e+38  ;;  %v871_v4 = vsel %vm174_vm1, %v130_v59, -3.4028235e+38 }
  0xa3   :  { %163 = vst [vmem:[#allocation2 + $0x38] sm:$0xff] %v130_v59 }
  0xa5   :  { %v141_v60 = vpop.f32.mrf.mxu2 }
  0xa6   :  { %v142_v61 = vadd.f32 %v786_v22, %v141_v60 }
  0xa7   :  { %v153_v63 = vpop.f32.mrf.mxu3 }
  0xa8   :  { %167 = vst [vmem:[#allocation2 + $0x58] sm:$0xff] %v142_v61  ;;  %v855_v0 = vsel %vm174_vm1, %v142_v61, -3.4028235e+38  ;;  %v154_v1 = vadd.f32 %v786_v22, %v153_v63 }
  0xa9   :  { %213 = vmax.xlane.f32.xlu2 %v855_v0 }
  0xaa   :  { %197 = vmax.xlane.f32.xlu1 %v851_v62  ;;  %215 = vmax.xlane.f32.xlu0 %v861_v2  ;;  %171 = vst [vmem:[#allocation2 + $0x78] sm:$0xff] %v154_v1  ;;  %v875_v5 = vsel %vm174_vm1, %v154_v1, -3.4028235e+38 }
  0xab   :  { %569 = dma.vmem_to_hbm [thread:$0]  %s562_s5, 2048, %s564_s29, [#allocation3], %s677_s6, %s677_s6, %s678_s7  }
  0xb1   :  { %219 = vmax.xlane.f32.xlu2 %v867_v3 }
  0xb2   :  { %205 = vmax.xlane.f32.xlu1 %v871_v4  ;;  %221 = vmax.xlane.f32.xlu0 %v875_v5 }
  0xba   :  { %217 = vmax.xlane.f32.xlu1 %v882_v6 }
  0xfd   :  { %v192_v7 = vpop.xlane.xlu0 %191 }
  0xfe   :  { %v200_v8 = vpop.xlane.xlu2 %199  ;;  %vm223_vm2 = vcmp.eq.f32.partialorder %v793_v27, %v192_v7 }
  0xff   :  { %vm227_vm3 = vcmp.eq.f32.partialorder %v797_v28, %v200_v8  ;;  %vm239_vm4 = vmand %vm223_vm2, %vm174_vm1 }
 0x100   :  { %vm243_vm5 = vmand %vm227_vm3, %vm174_vm1  ;;  %v892_v9 = vsel %vm239_vm4, %v781_v21, 128 }
 0x101   :  { %v895_v10 = vsel %vm243_vm5, %v781_v21, 128  ;;  %v272_v11 = vshra.s32 %v892_v9, 16 }
 0x102   :  { %v328_v12 = vshra.s32 %v895_v10, 16 }
 0x103   :  { %v899_v13 = vcvt.s32.f32 %v272_v11  ;;  %v327_v11 = vand.u32 65535, %v895_v10 }
 0x104   :  { %v901_v14 = vcvt.s32.f32 %v328_v12 }
 0x105   :  { %275 = vmin.xlane.f32.xlu1 %v899_v13  ;;  %v194_v15 = vpop.xlane.xlu0 %193 }
 0x106   :  { %331 = vmin.xlane.f32.xlu2 %v901_v14  ;;  %v208_v16 = vpop.xlane.xlu2 %207  ;;  %vm224_vm6 = vcmp.eq.f32.partialorder %v811_v38, %v194_v15 }
 0x107   :  { %vm231_vm7 = vcmp.eq.f32.partialorder %v805_v35, %v208_v16  ;;  %vm240_vm8 = vmand %vm224_vm6, %vm174_vm1 }
 0x108   :  { %vm247_vm9 = vmand %vm231_vm7, %vm174_vm1  ;;  %v912_v17 = vsel %vm240_vm8, %v781_v21, 128 }
 0x109   :  { %v915_v18 = vsel %vm247_vm9, %v781_v21, 128  ;;  %v286_v19 = vshra.s32 %v912_v17, 16 }
 0x10a   :  { %v384_v20 = vshra.s32 %v915_v18, 16  ;;  %v383_v10 = vand.u32 65535, %v915_v18 }
 0x10b   :  { %v919_v22 = vcvt.s32.f32 %v286_v19  ;;  %v329_v19 = vcvt.s32.f32 %v327_v11 }
 0x10c   :  { %v921_v23 = vcvt.s32.f32 %v384_v20 }
 0x10d   :  { %v196_v24 = vpop.xlane.xlu1 %195  ;;  %v210_v25 = vpop.xlane.xlu0 %209 }
 0x10e   :  { %v202_v26 = vpop.xlane.xlu2 %201  ;;  %387 = vmin.xlane.f32.xlu0 %v921_v23  ;;  %289 = vmin.xlane.f32.xlu2 %v919_v22  ;;  %vm232_vm10 = vcmp.eq.f32.partialorder %v823_v46, %v210_v25  ;;  %vm225_vm12 = vcmp.eq.f32.partialorder %v829_v49, %v196_v24 }
 0x10f   :  { %vm228_vm11 = vcmp.eq.f32.partialorder %v819_v45, %v202_v26  ;;  %vm248_vm14 = vmand %vm232_vm10, %vm174_vm1 }
 0x110   :  { %vm244_vm13 = vmand %vm228_vm11, %vm174_vm1  ;;  %v938_v28 = vsel %vm248_vm14, %v781_v21, 128 }
 0x111   :  { %v931_v27 = vsel %vm244_vm13, %v781_v21, 128  ;;  %vm241_vm15 = vmand %vm225_vm12, %vm174_vm1  ;;  %v398_v30 = vshra.s32 %v938_v28, 16  ;;  %v397_v18 = vand.u32 65535, %v938_v28 }
 0x112   :  { %v342_v29 = vshra.s32 %v931_v27, 16  ;;  %v945_v32 = vsel %vm241_vm15, %v781_v21, 128 }
 0x113   :  { %v947_v34 = vcvt.s32.f32 %v398_v30  ;;  %v300_v37 = vshra.s32 %v945_v32, 16  ;;  %v385_v30 = vcvt.s32.f32 %v383_v10 }
 0x114   :  { %v942_v31 = vcvt.s32.f32 %v342_v29 }
 0x115   :  { %v212_v33 = vpop.xlane.xlu1 %211  ;;  %v204_v35 = vpop.xlane.xlu0 %203  ;;  %401 = vmin.xlane.f32.xlu1 %v947_v34  ;;  %v968_v43 = vcvt.s32.f32 %v300_v37 }
 0x116   :  { %vm233_vm0 = vcmp.eq.f32.partialorder %v842_v57, %v212_v33  ;;  %345 = vmin.xlane.f32.xlu0 %v942_v31  ;;  %vm229_vm2 = vcmp.eq.f32.partialorder %v837_v53, %v204_v35 }
 0x117   :  { %vm249_vm3 = vmand %vm233_vm0, %vm174_vm1 }
 0x118   :  { %v956_v36 = vsel %vm249_vm3, %v781_v21, 128  ;;  %vm245_vm4 = vmand %vm229_vm2, %vm174_vm1 }
 0x119   :  { %v962_v38 = vsel %vm245_vm4, %v781_v21, 128  ;;  %v412_v39 = vshra.s32 %v956_v36, 16 }
 0x11a   :  { %v356_v40 = vshra.s32 %v962_v38, 16  ;;  %v355_v28 = vand.u32 65535, %v962_v38 }
 0x11b   :  { %v966_v41 = vcvt.s32.f32 %v412_v39  ;;  %v399_v39 = vcvt.s32.f32 %v397_v18 }
 0x11c   :  { %v214_v42 = vpop.xlane.xlu2 %213  ;;  %v970_v44 = vcvt.s32.f32 %v356_v40  ;;  %v411_v40 = vand.u32 65535, %v956_v36 }
 0x11d   :  { %vm234_vm5 = vcmp.eq.f32.partialorder %v855_v0, %v214_v42  ;;  %v198_v45 = vpop.xlane.xlu1 %197  ;;  %415 = vmin.xlane.f32.xlu2 %v966_v41  ;;  %v216_v46 = vpop.xlane.xlu0 %215 }
 0x11e   :  { %vm250_vm6 = vmand %vm234_vm5, %vm174_vm1  ;;  %vm226_vm7 = vcmp.eq.f32.partialorder %v851_v62, %v198_v45  ;;  %303 = vmin.xlane.f32.xlu0 %v968_v43  ;;  %359 = vmin.xlane.f32.xlu1 %v970_v44  ;;  %vm235_vm9 = vcmp.eq.f32.partialorder %v861_v2, %v216_v46  ;;  %v413_v45 = vcvt.s32.f32 %v411_v40 }
 0x11f   :  { %v979_v47 = vsel %vm250_vm6, %v781_v21, 128  ;;  %vm242_vm8 = vmand %vm226_vm7, %vm174_vm1 }
 0x120   :  { %v985_v48 = vsel %vm242_vm8, %v781_v21, 128  ;;  %v426_v49 = vshra.s32 %v979_v47, 16  ;;  %vm251_vm10 = vmand %vm235_vm9, %vm174_vm1  ;;  %v425_v38 = vand.u32 65535, %v979_v47 }
 0x121   :  { %v314_v50 = vshra.s32 %v985_v48, 16  ;;  %v998_v56 = vsel %vm251_vm10, %v781_v21, 128 }
 0x122   :  { %v994_v53 = vcvt.s32.f32 %v426_v49  ;;  %v440_v61 = vshra.s32 %v998_v56, 16 }
 0x123   :  { %v992_v51 = vcvt.s32.f32 %v314_v50  ;;  %v357_v50 = vcvt.s32.f32 %v355_v28 }
 0x124   :  { %v220_v52 = vpop.xlane.xlu2 %219  ;;  %v1024_v1 = vcvt.s32.f32 %v440_v61 }
 0x125   :  { %vm237_vm11 = vcmp.eq.f32.partialorder %v867_v3, %v220_v52  ;;  %v206_v54 = vpop.xlane.xlu1 %205  ;;  %v222_v55 = vpop.xlane.xlu0 %221 }
 0x126   :  { %vm253_vm12 = vmand %vm237_vm11, %vm174_vm1  ;;  %vm230_vm13 = vcmp.eq.f32.partialorder %v871_v4, %v206_v54  ;;  %429 = vmin.xlane.f32.xlu0 %v994_v53  ;;  %317 = vmin.xlane.f32.xlu1 %v992_v51  ;;  %vm238_vm15 = vcmp.eq.f32.partialorder %v875_v5, %v222_v55  ;;  %v427_v54 = vcvt.s32.f32 %v425_v38 }
 0x127   :  { %v1005_v57 = vsel %vm253_vm12, %v781_v21, 128  ;;  %vm246_vm14 = vmand %vm230_vm13, %vm174_vm1 }
 0x128   :  { %v1011_v58 = vsel %vm246_vm14, %v781_v21, 128  ;;  %v468_v59 = vshra.s32 %v1005_v57, 16  ;;  %vm254_vm0 = vmand %vm238_vm15, %vm174_vm1  ;;  %v467_v47 = vand.u32 65535, %v1005_v57 }
 0x129   :  { %v370_v60 = vshra.s32 %v1011_v58, 16  ;;  %v1027_v2 = vsel %vm254_vm0, %v781_v21, 128 }
 0x12a   :  { %v1021_v63 = vcvt.s32.f32 %v468_v59  ;;  %v482_v5 = vshra.s32 %v1027_v2, 16 }
 0x12b   :  { %v1019_v62 = vcvt.s32.f32 %v370_v60  ;;  %v369_v60 = vand.u32 65535, %v1011_v58 }
 0x12c   :  { %v1042_v8 = vcvt.s32.f32 %v482_v5 }
 0x12d   :  { %v218_v0 = vpop.xlane.xlu1 %217  ;;  %373 = vmin.xlane.f32.xlu2 %v1019_v62 }
 0x12e   :  { %vm236_vm2 = vcmp.eq.f32.partialorder %v882_v6, %v218_v0  ;;  %471 = vmin.xlane.f32.xlu0 %v1021_v63  ;;  %443 = vmin.xlane.f32.xlu1 %v1024_v1  ;;  %v271_v6 = vand.u32 65535, %v892_v9  ;;  %v285_v9 = vand.u32 65535, %v912_v17  ;;  %v341_v17 = vand.u32 65535, %v931_v27 }
 0x12f   :  { %vm252_vm3 = vmand %vm236_vm2, %vm174_vm1  ;;  %v299_v27 = vand.u32 65535, %v945_v32  ;;  %v371_v0 = vcvt.s32.f32 %v369_v60 }
 0x130   :  { %v1035_v3 = vsel %vm252_vm3, %v781_v21, 128  ;;  %v273_v15 = vcvt.s32.f32 %v271_v6  ;;  %v287_v29 = vcvt.s32.f32 %v285_v9  ;;  %v343_v35 = vcvt.s32.f32 %v341_v17 }
 0x131   :  { %v454_v4 = vshra.s32 %v1035_v3, 16  ;;  %v453_v58 = vand.u32 65535, %v1035_v3  ;;  %v496_v17 = vadd.s32 4294967288, %v781_v21 }
 0x133   :  { %v1039_v7 = vcvt.s32.f32 %v454_v4  ;;  %v455_v11 = vcvt.s32.f32 %v453_v58 }
 0x135   :  { %457 = vmin.xlane.f32.xlu2 %v1039_v7 }
 0x136   :  { %485 = vmin.xlane.f32.xlu1 %v1042_v8 }
 0x178   :  { %v1047_v12 = vpop.xlane.xlu1 %275 }
 0x179   :  { %v1049_v16 = vpop.xlane.xlu2 %331  ;;  %vm277_vm1 = vcmp.eq.f32.partialorder %v899_v13, %v1047_v12 }
 0x17a   :  { %vm333_vm4 = vcmp.eq.f32.partialorder %v901_v14, %v1049_v16  ;;  %v278_v20 = vsel %vm277_vm1, %v273_v15, inf  ;;  %vm498_vm1 = vcmask 130112  }
 0x17b   :  { %v334_v24 = vsel %vm333_vm4, %v329_v19, inf  ;;  %279 = vmin.xlane.f32.xlu2 %v278_v20  ;;  %vm502_vm4 = vcmask 195712  }
 0x17c   :  { %335 = vmin.xlane.f32.xlu0 %v334_v24  ;;  %v282_v24 = vcvt.f32.s32 %v1047_v12 }
 0x17e   :  { %v283_v10 = vshll.u32 %v282_v24, 16  ;;  %v512_v24 = vadd.s32 4294967256, %v781_v21 }
 0x181   :  { %v1057_v25 = vpop.xlane.xlu2 %289  ;;  %v1059_v26 = vpop.xlane.xlu0 %387 }
 0x182   :  { %vm291_vm5 = vcmp.eq.f32.partialorder %v919_v22, %v1057_v25  ;;  %vm389_vm6 = vcmp.eq.f32.partialorder %v921_v23, %v1059_v26  ;;  %v296_v9 = vcvt.f32.s32 %v1057_v25 }
 0x183   :  { %v292_v13 = vsel %vm291_vm5, %v287_v29, inf  ;;  %v390_v14 = vsel %vm389_vm6, %v385_v30, inf  ;;  %vm506_vm5 = vcmask 261312   ;;  %vm510_vm6 = vcmask 326912  }
 0x184   :  { %293 = vmin.xlane.f32.xlu0 %v292_v13  ;;  %391 = vmin.xlane.f32.xlu1 %v390_v14  ;;  %v297_v13 = vshll.u32 %v296_v9, 16 }
 0x188   :  { %v1069_v37 = vpop.xlane.xlu1 %401 }
 0x189   :  { %v1067_v33 = vpop.xlane.xlu0 %345  ;;  %vm403_vm8 = vcmp.eq.f32.partialorder %v947_v34, %v1069_v37 }
 0x18a   :  { %vm347_vm7 = vcmp.eq.f32.partialorder %v942_v31, %v1067_v33  ;;  %v404_v23 = vsel %vm403_vm8, %v399_v39, inf  ;;  %v301_v31 = vcvt.s32.f32 %v299_v27  ;;  %vm518_vm8 = vcmask 458112  }
 0x18b   :  { %v348_v22 = vsel %vm347_vm7, %v343_v35, inf  ;;  %405 = vmin.xlane.f32.xlu2 %v404_v23  ;;  %vm514_vm7 = vcmask 392512  }
 0x18c   :  { %349 = vmin.xlane.f32.xlu1 %v348_v22 }
 0x190   :  { %v1078_v42 = vpop.xlane.xlu2 %415 }
 0x191   :  { %v1080_v46 = vpop.xlane.xlu0 %303  ;;  %vm417_vm9 = vcmp.eq.f32.partialorder %v966_v41, %v1078_v42  ;;  %v1084_v34 = vpop.xlane.xlu1 %359  ;;  %v313_v41 = vand.u32 65535, %v985_v48  ;;  %v439_v48 = vand.u32 65535, %v998_v56 }
 0x192   :  { %v418_v49 = vsel %vm417_vm9, %v413_v45, inf  ;;  %vm305_vm10 = vcmp.eq.f32.partialorder %v968_v43, %v1080_v46  ;;  %vm361_vm11 = vcmp.eq.f32.partialorder %v970_v44, %v1084_v34  ;;  %v310_v25 = vcvt.f32.s32 %v1080_v46 }
 0x193   :  { %419 = vmin.xlane.f32.xlu0 %v418_v49  ;;  %v306_v32 = vsel %vm305_vm10, %v301_v31, inf  ;;  %v362_v36 = vsel %vm361_vm11, %v357_v50, inf  ;;  %v315_v59 = vcvt.s32.f32 %v313_v41  ;;  %v441_v6 = vcvt.s32.f32 %v439_v48 }
 0x194   :  { %307 = vmin.xlane.f32.xlu1 %v306_v32  ;;  %363 = vmin.xlane.f32.xlu2 %v362_v36  ;;  %v311_v27 = vshll.u32 %v310_v25, 16  ;;  %v500_v45 = vadd.s32 4294967280, %v781_v21  ;;  %v338_v49 = vcvt.f32.s32 %v1049_v16  ;;  %v394_v50 = vcvt.f32.s32 %v1059_v26 }
 0x195   :  { %v352_v32 = vcvt.f32.s32 %v1067_v33  ;;  %v408_v36 = vcvt.f32.s32 %v1069_v37  ;;  %v422_v41 = vcvt.f32.s32 %v1078_v42  ;;  %vm522_vm9 = vcmask 523712  }
 0x196   :  { %v339_v26 = vshll.u32 %v338_v49, 16  ;;  %v395_v60 = vshll.u32 %v394_v50, 16  ;;  %vm526_vm10 = vcmask 589312   ;;  %vm530_vm11 = vcmask 654912  }
 0x197   :  { %v353_v33 = vshll.u32 %v352_v32, 16  ;;  %v409_v37 = vshll.u32 %v408_v36, 16 }
 0x199   :  { %v1092_v52 = vpop.xlane.xlu0 %429  ;;  %v1094_v55 = vpop.xlane.xlu1 %317 }
 0x19a   :  { %vm431_vm12 = vcmp.eq.f32.partialorder %v994_v53, %v1092_v52  ;;  %vm319_vm13 = vcmp.eq.f32.partialorder %v992_v51, %v1094_v55  ;;  %v469_v53 = vcvt.s32.f32 %v467_v47  ;;  %v436_v46 = vcvt.f32.s32 %v1092_v52 }
 0x19b   :  { %v432_v43 = vsel %vm431_vm12, %v427_v54, inf  ;;  %v320_v44 = vsel %vm319_vm13, %v315_v59, inf  ;;  %v366_v54 = vcvt.f32.s32 %v1084_v34  ;;  %v324_v59 = vcvt.f32.s32 %v1094_v55 }
 0x19c   :  { %433 = vmin.xlane.f32.xlu1 %v432_v43  ;;  %321 = vmin.xlane.f32.xlu2 %v320_v44  ;;  %v423_v52 = vshll.u32 %v422_v41, 16  ;;  %vm534_vm12 = vcmask 720512   ;;  %vm538_vm13 = vcmask 786112  }
 0x1a0   :  { %v1103_v61 = vpop.xlane.xlu2 %373 }
 0x1a1   :  { %v1105_v4 = vpop.xlane.xlu0 %471  ;;  %vm375_vm14 = vcmp.eq.f32.partialorder %v1019_v62, %v1103_v61  ;;  %v1109_v51 = vpop.xlane.xlu1 %443  ;;  %v481_v62 = vand.u32 65535, %v1027_v2  ;;  %v380_v43 = vcvt.f32.s32 %v1103_v61  ;;  %v325_v61 = vshll.u32 %v324_v59, 16 }
 0x1a2   :  { %v376_v5 = vsel %vm375_vm14, %v371_v0, inf  ;;  %vm473_vm15 = vcmp.eq.f32.partialorder %v1021_v63, %v1105_v4  ;;  %vm445_vm0 = vcmp.eq.f32.partialorder %v1024_v1, %v1109_v51  ;;  %v478_v16 = vcvt.f32.s32 %v1105_v4 }
 0x1a3   :  { %377 = vmin.xlane.f32.xlu0 %v376_v5  ;;  %v474_v56 = vsel %vm473_vm15, %v469_v53, inf  ;;  %v446_v57 = vsel %vm445_vm0, %v441_v6, inf  ;;  %v483_v15 = vcvt.s32.f32 %v481_v62  ;;  %v450_v48 = vcvt.f32.s32 %v1109_v51 }
 0x1a4   :  { %475 = vmin.xlane.f32.xlu1 %v474_v56  ;;  %447 = vmin.xlane.f32.xlu2 %v446_v57  ;;  %v367_v53 = vshll.u32 %v366_v54, 16  ;;  %v437_v5 = vshll.u32 %v436_v46, 16  ;;  %v381_v56 = vshll.u32 %v380_v43, 16  ;;  %v1150_v4 = vshll.u32 %v478_v16, 16 }
 0x1a5   :  { %v508_v62 = vadd.s32 4294967264, %v781_v21  ;;  %v504_v51 = vadd.s32 4294967272, %v781_v21  ;;  %v540_v46 = vadd.s32 4294967200, %v781_v21  ;;  %vm542_vm14 = vcmask 851712  }
 0x1a6   :  { %vm546_vm15 = vcmask 917312   ;;  %vm550_vm0 = vcmask 982912  }
 0x1a8   :  { %v1120_v63 = vpop.xlane.xlu2 %457 }
 0x1a9   :  { %vm459_vm2 = vcmp.eq.f32.partialorder %v1039_v7, %v1120_v63  ;;  %v1124_v1 = vpop.xlane.xlu1 %485  ;;  %v464_v42 = vcvt.f32.s32 %v1120_v63  ;;  %v451_v63 = vshll.u32 %v450_v48, 16  ;;  %v544_v48 = vadd.s32 4294967192, %v781_v21 }
 0x1aa   :  { %v460_v3 = vsel %vm459_vm2, %v455_v11, inf  ;;  %vm487_vm3 = vcmp.eq.f32.partialorder %v1042_v8, %v1124_v1  ;;  %vm554_vm2 = vcmask 1048512  }
 0x1ab   :  { %461 = vmin.xlane.f32.xlu0 %v460_v3  ;;  %v488_v2 = vsel %vm487_vm3, %v483_v15, inf  ;;  %v1154_v15 = vshll.u32 %v464_v42, 16 }
 0x1ac   :  { %489 = vmin.xlane.f32.xlu2 %v488_v2  ;;  %v492_v2 = vcvt.f32.s32 %v1124_v1 }
 0x1ee   :  { %v280_v20 = vpop.xlane.xlu2 %279 }
 0x1ef   :  { %v336_v19 = vpop.xlane.xlu0 %335  ;;  %v281_v7 = vcvt.f32.s32 %v280_v20  ;;  %v528_v20 = vadd.s32 4294967224, %v781_v21 }
 0x1f0   :  { %v337_v47 = vcvt.f32.s32 %v336_v19  ;;  %v524_v19 = vadd.s32 4294967232, %v781_v21 }
 0x1f1   :  { %v284_v14 = vadd.s32 %v283_v10, %v281_v7 }
 0x1f2   :  { %v340_v11 = vadd.s32 %v339_v26, %v337_v47  ;;  %v493_v26 = vshll.u32 %v492_v2, 16 }
 0x1f3   :  { %v495_v8 = vperm.slane %v284_v14, %v781_v21 }
 0x1f4   :  { %v509_v14 = vperm.slane %v340_v11, %v508_v62 }
 0x1f7   :  { %v1130_v29 = vpop.xlane.xlu1 %391  ;;  %v294_v30 = vpop.xlane.xlu0 %293 }
 0x1f8   :  { %v295_v18 = vcvt.f32.s32 %v294_v30  ;;  %v393_v10 = vcvt.f32.s32 %v1130_v29  ;;  %v516_v30 = vadd.s32 4294967248, %v781_v21 }
 0x1fa   :  { %v298_v35 = vadd.s32 %v297_v13, %v295_v18  ;;  %v396_v29 = vadd.s32 %v395_v60, %v393_v10 }
 0x1fc   :  { %v497_v39 = vperm.slane %v298_v35, %v496_v17  ;;  %v520_v35 = vadd.s32 4294967240, %v781_v21  ;;  %v525_v43 = vperm.slane %v396_v29, %v524_v19 }
 0x1fe   :  { %v499_v22 = vsel %vm498_vm1, %v497_v39, %v495_v8  ;;  %v1134_v12 = vpop.xlane.xlu2 %405 }
 0x1ff   :  { %v350_v23 = vpop.xlane.xlu1 %349  ;;  %v407_v17 = vcvt.f32.s32 %v1134_v12 }
 0x200   :  { %v351_v55 = vcvt.f32.s32 %v350_v23 }
 0x202   :  { %v354_v9 = vadd.s32 %v353_v33, %v351_v55 }
 0x204   :  { %v513_v39 = vperm.slane %v354_v9, %v512_v24 }
 0x206   :  { %v420_v0 = vpop.xlane.xlu0 %419 }
 0x207   :  { %v308_v40 = vpop.xlane.xlu1 %307  ;;  %v364_v28 = vpop.xlane.xlu2 %363  ;;  %v421_v1 = vcvt.f32.s32 %v420_v0 }
 0x208   :  { %v309_v31 = vcvt.f32.s32 %v308_v40  ;;  %v365_v57 = vcvt.f32.s32 %v364_v28 }
 0x209   :  { %v424_v36 = vadd.s32 %v423_v52, %v421_v1 }
 0x20a   :  { %v312_v38 = vadd.s32 %v311_v27, %v309_v31  ;;  %v368_v13 = vadd.s32 %v367_v53, %v365_v57  ;;  %v532_v27 = vadd.s32 4294967216, %v781_v21  ;;  %v410_v31 = vadd.s32 %v409_v37, %v407_v17 }
 0x20c   :  { %v501_v44 = vperm.slane %v312_v38, %v500_v45  ;;  %v517_v40 = vperm.slane %v368_v13, %v516_v30  ;;  %v536_v38 = vadd.s32 4294967208, %v781_v21  ;;  %v529_v60 = vperm.slane %v410_v31, %v528_v20 }
 0x20d   :  { %v533_v47 = vperm.slane %v424_v36, %v532_v27 }
 0x20e   :  { %v503_v34 = vsel %vm502_vm4, %v501_v44, %v499_v22 }
 0x20f   :  { %v434_v6 = vpop.xlane.xlu1 %433  ;;  %v322_v58 = vpop.xlane.xlu2 %321 }
 0x210   :  { %v323_v3 = vcvt.f32.s32 %v322_v58  ;;  %v435_v23 = vcvt.f32.s32 %v434_v6 }
 0x212   :  { %v326_v7 = vadd.s32 %v325_v61, %v323_v3  ;;  %v438_v54 = vadd.s32 %v437_v5, %v435_v23  ;;  %v548_v5 = vadd.s32 4294967184, %v781_v21 }
 0x214   :  { %v505_v18 = vperm.slane %v326_v7, %v504_v51 }
 0x216   :  { %v378_v8 = vpop.xlane.xlu0 %377  ;;  %v507_v22 = vsel %vm506_vm5, %v505_v18, %v503_v34  ;;  %v537_v34 = vperm.slane %v438_v54, %v536_v38 }
 0x217   :  { %v379_v25 = vcvt.f32.s32 %v378_v8  ;;  %v511_v28 = vsel %vm510_vm6, %v509_v14, %v507_v22  ;;  %v448_v45 = vpop.xlane.xlu2 %447  ;;  %v476_v49 = vpop.xlane.xlu1 %475 }
 0x218   :  { %v449_v12 = vcvt.f32.s32 %v448_v45  ;;  %v515_v50 = vsel %vm514_vm7, %v513_v39, %v511_v28  ;;  %v477_v44 = vcvt.f32.s32 %v476_v49 }
 0x219   :  { %v382_v32 = vadd.s32 %v381_v56, %v379_v25  ;;  %v519_v41 = vsel %vm518_vm8, %v517_v40, %v515_v50  ;;  %v552_v56 = vadd.s32 4294967176, %v781_v21 }
 0x21a   :  { %v452_v16 = vadd.s32 %v451_v63, %v449_v12  ;;  %v480_v55 = vadd.s32 %v1150_v4, %v477_v44 }
 0x21b   :  { %v521_v59 = vperm.slane %v382_v32, %v520_v35 }
 0x21c   :  { %v541_v53 = vperm.slane %v452_v16, %v540_v46  ;;  %v549_v4 = vperm.slane %v480_v55, %v548_v5 }
 0x21d   :  { %v523_v33 = vsel %vm522_vm9, %v521_v59, %v519_v41 }
 0x21e   :  { %v527_v37 = vsel %vm526_vm10, %v525_v43, %v523_v33  ;;  %v462_v42 = vpop.xlane.xlu0 %461 }
 0x21f   :  { %v531_v0 = vsel %vm530_vm11, %v529_v60, %v527_v37  ;;  %v463_v52 = vcvt.f32.s32 %v462_v42  ;;  %v490_v6 = vpop.xlane.xlu2 %489 }
 0x220   :  { %v535_v61 = vsel %vm534_vm12, %v533_v47, %v531_v0  ;;  %v491_v57 = vcvt.f32.s32 %v490_v6 }
 0x221   :  { %v466_v58 = vadd.s32 %v1154_v15, %v463_v52  ;;  %v539_v62 = vsel %vm538_vm13, %v537_v34, %v535_v61 }
 0x222   :  { %v543_v11 = vsel %vm542_vm14, %v541_v53, %v539_v62  ;;  %v494_v51 = vadd.s32 %v493_v26, %v491_v57 }
 0x223   :  { %v545_v3 = vperm.slane %v466_v58, %v544_v48 }
 0x224   :  { %v553_v63 = vperm.slane %v494_v51, %v552_v56 }
 0x225   :  { %v547_v2 = vsel %vm546_vm15, %v545_v3, %v543_v11 }
 0x226   :  { %v551_v21 = vsel %vm550_vm0, %v549_v4, %v547_v2 }
 0x227   :  { %v555_v15 = vsel %vm554_vm2, %v553_v63, %v551_v21 }
 0x228   :  { %556 = vst [vmem:[#allocation4] sm:$0x1] %v555_v15 }
 0x229   :  { %580 = dma.vmem_to_hbm [thread:$0]  %s576_s8, 16, %s578_s11, [#allocation5]  }
 0x22a   :  { %672 = dma.done.wait [#allocation3], 2048  }
 0x22b   :  { %673 = vsyncadd [#allocation3], 4294965248 }
 0x22c   :  { %674 = dma.done.wait [#allocation5], 16  }
 0x22d   :  { %675 = vsyncadd [#allocation5], 4294967280 }
 0x22e   :  { %589 = vsyncpa [#allocation3], 1 }
 0x22f   :  { %590 = vsyncpa [#allocation5], 1 }

</bundles_post_ra>
